<compile_context>
chip_gen: v7x
topology: tpu7x:2x2x1
jax: 0.10.0
libtpu: 0.0.40
codegen_flags: <defaults>
</compile_context>

<pallas_src>
import functools
import math

import jax
import jax.numpy as jnp
from jax.experimental import pallas as pl
from jax.experimental.pallas import tpu as pltpu

# WingLoss hyperparameters (match PyTorch __init__ defaults)
W = 10.0
E = 2.0
INV_E = 1.0 / E
C_CONST = W - W * math.log(1.0 + W / E)

LANES = 128
SUBLANES = 8
MAX_TILE_ROWS = 4096   # 2 MiB f32 per input per block; double-buffered inputs
                       # stay well inside scoped VMEM on v5e/v6e/v7x.
CHUNK_ROWS = 512       # in-kernel compute sub-chunk (bounds live intermediates)


def _cdiv(a, b):
    return -(-a // b)


def _round_up(a, b):
    return _cdiv(a, b) * b


def _wing_loss_kernel(x_ref, t_ref, o_ref, *, tile_rows, chunk_rows,
                      blocks_per_core, total_blocks, valid_rows,
                      needs_mask, has_overflow):
    p = pl.program_id(0)   # core / outer split index ("parallel")
    i = pl.program_id(1)   # row-block index within this split ("arbitrary")
    g = p * blocks_per_core + i   # global block index (may overflow range)

    # Zero this split's accumulator block at the start of its sweep.
    @pl.when(i == 0)
    def _():
        o_ref[...] = jnp.zeros_like(o_ref)

    n_chunks = tile_rows // chunk_rows

    def chunk_body(c, masked):
        r0 = c * chunk_rows
        if not isinstance(r0, int):
            r0 = pl.multiple_of(r0, chunk_rows)
        x = x_ref[pl.ds(r0, chunk_rows), :].astype(jnp.float32)
        t = t_ref[pl.ds(r0, chunk_rows), :].astype(jnp.float32)

        # weight == 0 where target == -1 (ignored landmarks)
        keep = t != -1.0
        if masked:
            # Ragged last block: rows past the valid extent hold garbage
            # (Pallas does not zero-fill partial blocks) -> mask them out.
            row_ids = (g * tile_rows + r0
                       + jax.lax.broadcasted_iota(jnp.int32,
                                                  (chunk_rows, LANES), 0))
            keep = jnp.logical_and(keep, row_ids < valid_rows)

        diff = jnp.where(keep, x - t, 0.0)
        abs_diff = jnp.abs(diff)
        y = jnp.where(abs_diff < W,
                      W * jnp.log1p(abs_diff * INV_E),
                      abs_diff - C_CONST)

        # Fold (chunk_rows, 128) -> (8, 128) with VPU adds only (layout-free
        # reshape splits the sublane-tiled row axis) and accumulate into the
        # output block, which stays VMEM-resident across the inner grid axis.
        partial = y.reshape(chunk_rows // SUBLANES, SUBLANES, LANES).sum(axis=0)
        o_ref[...] += partial[jnp.newaxis]

    def accumulate(masked):
        if n_chunks == 1:
            chunk_body(0, masked)
        else:
            def body(c, carry):
                chunk_body(c, masked)
                return carry
            jax.lax.fori_loop(0, n_chunks, body, 0, unroll=True)

    def guarded(cond, masked):
        @pl.when(cond)
        def _():
            accumulate(masked)

    if needs_mask:
        is_last = g == total_blocks - 1
        if has_overflow:
            in_range = g < total_blocks
            guarded(jnp.logical_and(in_range, is_last), True)
            guarded(jnp.logical_and(in_range, jnp.logical_not(is_last)), False)
        else:
            guarded(is_last, True)
            guarded(jnp.logical_not(is_last), False)
    else:
        if has_overflow:
            guarded(g < total_blocks, False)
        else:
            accumulate(False)


def _wing_tail(x, t):
    """Plain-jnp WingLoss sum for a tiny (<128 element) tail."""
    x = x.astype(jnp.float32)
    t = t.astype(jnp.float32)
    keep = t != -1.0
    diff = jnp.where(keep, x - t, 0.0)
    abs_diff = jnp.abs(diff)
    y = jnp.where(abs_diff < W,
                  W * jnp.log1p(abs_diff * INV_E),
                  abs_diff - C_CONST)
    return jnp.sum(y)


def _row_granularity(dtype):
    # Minimum sublane-tile row multiple: 8 (f32), 16 (16-bit), 32 (8-bit).
    return max(SUBLANES, 32 // jnp.dtype(dtype).itemsize)


def wing_loss(x, t, sigma=1):
    """Pallas WingLoss forward. x, t: same-shape arrays. Returns a scalar."""
    del sigma  # unused, same as the PyTorch forward

    # Keep floating inputs in their storage dtype (streaming bf16 halves HBM
    # traffic); cast to f32 only inside the kernel.  Non-floats cast here.
    if not jnp.issubdtype(x.dtype, jnp.floating):
        x = x.astype(jnp.float32)
    if not jnp.issubdtype(t.dtype, jnp.floating):
        t = t.astype(jnp.float32)

    x_flat = x.reshape(-1)
    t_flat = t.reshape(-1)
    n = x_flat.shape[0]

    # Only requirement for a copy-free (rows, 128) view: n % 128 == 0.
    # Any row-level raggedness is masked in-kernel on the last block only.
    n_aligned = n - (n % LANES)
    tail = n - n_aligned

    tail_sum = jnp.float32(0.0)
    if tail:
        # <128-element tail handled with plain jnp; no full-tensor pad.
        tail_sum = _wing_tail(x_flat[n_aligned:], t_flat[n_aligned:])

    if n_aligned == 0:
        return tail_sum

    if tail:
        x_flat = x_flat[:n_aligned]
        t_flat = t_flat[:n_aligned]

    rows = n_aligned // LANES
    x2d = x_flat.reshape(rows, LANES)
    t2d = t_flat.reshape(rows, LANES)

    # Row granularity honoring sublane packing of both input dtypes.
    gran = max(_row_granularity(x2d.dtype), _row_granularity(t2d.dtype))

    chunk_rows = min(CHUNK_ROWS, _round_up(rows, gran))      # mult. of gran
    tile_rows = min(MAX_TILE_ROWS, _round_up(rows, chunk_rows))  # mult. of chunk

    total_blocks = _cdiv(rows, tile_rows)
    needs_mask = (rows % tile_rows) != 0          # ragged last block?

    # Always shard across both TensorCores when there is more than one block
    # (megacore / v7x); harmless serial split on single-TC parts.
    ncores = 2 if total_blocks >= 2 else 1
    blocks_per_core = _cdiv(total_blocks, ncores)
    has_overflow = ncores * blocks_per_core > total_blocks

    kernel = functools.partial(
        _wing_loss_kernel,
        tile_rows=tile_rows,
        chunk_rows=chunk_rows,
        blocks_per_core=blocks_per_core,
        total_blocks=total_blocks,
        valid_rows=rows,
        needs_mask=needs_mask,
        has_overflow=has_overflow,
    )

    def in_map(p, i):
        g = p * blocks_per_core + i
        if has_overflow:
            g = jnp.minimum(g, total_blocks - 1)   # clamp; skipped in-kernel
        return (g, 0)

    # Explicit VMEM budget: double-buffered input blocks + intermediate headroom.
    in_block_bytes = tile_rows * LANES * (x2d.dtype.itemsize + t2d.dtype.itemsize)
    vmem_limit = min(max(2 * in_block_bytes + (8 << 20), 16 << 20), 48 << 20)

    cost = pl.CostEstimate(
        flops=10 * n_aligned,
        transcendentals=n_aligned,
        bytes_accessed=n_aligned * (x2d.dtype.itemsize + t2d.dtype.itemsize)
        + ncores * SUBLANES * LANES * 4,
    )

    out = pl.pallas_call(
        kernel,
        out_shape=jax.ShapeDtypeStruct((ncores, SUBLANES, LANES), jnp.float32),
        grid_spec=pltpu.PrefetchScalarGridSpec(
            num_scalar_prefetch=0,
            grid=(ncores, blocks_per_core),
            in_specs=[
                pl.BlockSpec((tile_rows, LANES), in_map),
                pl.BlockSpec((tile_rows, LANES), in_map),
            ],
            out_specs=pl.BlockSpec((1, SUBLANES, LANES),
                                   lambda p, i: (p, 0, 0)),
        ),
        compiler_params=pltpu.CompilerParams(
            dimension_semantics=("parallel", "arbitrary"),
            vmem_limit_bytes=int(vmem_limit),
        ),
        cost_estimate=cost,
    )(x2d, t2d)

    # Tiny (ncores, 8, 128) final reduction outside the kernel.
    return jnp.sum(out) + tail_sum


def wing_loss_ref(x, t):
    """Pure-JAX reference matching the PyTorch semantics."""
    x = x.astype(jnp.float32)
    t = t.astype(jnp.float32)
    weight = jnp.where(t == -1.0, 0.0, 1.0)
    diff = weight * (x - t)
    abs_diff = jnp.abs(diff)
    flag = (abs_diff < W).astype(jnp.float32)
    y = flag * W * jnp.log1p(abs_diff / E) + (1.0 - flag) * (abs_diff - C_CONST)
    return jnp.sum(y)


if __name__ == "__main__":
    key = jax.random.PRNGKey(0)

    def make_inputs(k, shape, dtype=jnp.float32):
        kx, kt, km = jax.random.split(k, 3)
        xx = jax.random.normal(kx, shape, dtype=jnp.float32) * 8.0  # both branches
        tt = jax.random.normal(kt, shape, dtype=jnp.float32) * 3.0
        ignore = jax.random.uniform(km, shape) < 0.2                # ~20% ignored
        tt = jnp.where(ignore, -1.0, tt)
        return xx.astype(dtype), tt.astype(dtype)

    cases = [
        ((2, 4, 16, 16), jnp.float32),    # aligned, single tiny block
        ((2, 3, 17, 19), jnp.float32),    # n % 128 != 0 -> jnp tail + masked block
        ((8, 4, 144, 240), jnp.float32),  # multi-block: 2 cores, overflow skip,
                                          # ragged last block, sub-chunked compute
        ((2, 4, 16, 16), jnp.bfloat16),   # 16-bit sublane-packing path
    ]
    for shape, dtype in cases:
        key, sub = jax.random.split(key)
        x, t = make_inputs(sub, shape, dtype)
        out = jax.block_until_ready(wing_loss(x, t))
        ref = jax.block_until_ready(wing_loss_ref(x, t))
        assert jnp.allclose(out, ref, rtol=2e-4, atol=1e-2), (shape, dtype, out, ref)

    print("KERNEL_OK")
</pallas_src>

<mosaic_0001>
module attributes {stable_mosaic.version = 11 : i64} {
  func.func @_wing_loss_kernel(%arg0: i32, %arg1: i32, %arg2: memref<16x128xf32, #tpu.memory_space<vmem>>, %arg3: memref<16x128xf32, #tpu.memory_space<vmem>>, %arg4: memref<1x8x128xf32, #tpu.memory_space<vmem>>) attributes {dimension_semantics = [#tpu.dimension_semantics<parallel>, #tpu.dimension_semantics<arbitrary>], iteration_bounds = array<i64: 1, 1>, scalar_prefetch = 0 : i64, scratch_operands = 0 : i64, tpu.core_type = #tpu.core_type<tc>, window_params = [{transform_indices = @transform_0, window_bounds = array<i64: 16, 128>}, {transform_indices = @transform_1, window_bounds = array<i64: 16, 128>}, {transform_indices = @transform_2, window_bounds = array<i64: 1, 8, 128>}]} {
    %c0_i32 = arith.constant 0 : i32
    %0 = arith.cmpi eq, %arg1, %c0_i32 : i32
    %1 = arith.extui %0 : i1 to i32
    %c0_i32_0 = arith.constant 0 : i32
    %2 = arith.cmpi ne, %1, %c0_i32_0 : i32
    scf.if %2 {
      %cst_16 = arith.constant 0.000000e+00 : f32
      %27 = vector.broadcast %cst_16 : f32 to vector<1x8x128xf32>
      %c0_17 = arith.constant 0 : index
      %c0_18 = arith.constant 0 : index
      %c0_19 = arith.constant 0 : index
      %28 = vector.load %arg4[%c0_17, %c0_18, %c0_19] : memref<1x8x128xf32, #tpu.memory_space<vmem>>, vector<1x8x128xf32>
      tpu.vector_store %arg4[%c0_17, %c0_18, %c0_19], %27 {strides = array<i32>} : memref<1x8x128xf32, #tpu.memory_space<vmem>>, vector<1x8x128xf32>,
    } else {
    }
    %c0 = arith.constant 0 : index
    %c0_1 = arith.constant 0 : index
    %3 = vector.load %arg2[%c0, %c0_1] : memref<16x128xf32, #tpu.memory_space<vmem>>, vector<16x128xf32>
    %c0_2 = arith.constant 0 : index
    %c0_3 = arith.constant 0 : index
    %4 = vector.load %arg3[%c0_2, %c0_3] : memref<16x128xf32, #tpu.memory_space<vmem>>, vector<16x128xf32>
    %cst = arith.constant -1.000000e+00 : f32
    %5 = vector.broadcast %cst : f32 to vector<16x128xf32>
    %6 = arith.cmpf one, %4, %5 : vector<16x128xf32>
    %7 = arith.subf %3, %4 : vector<16x128xf32>
    %cst_4 = arith.constant 0.000000e+00 : f32
    %8 = vector.broadcast %cst_4 : f32 to vector<16x128xf32>
    %9 = arith.select %6, %7, %8 : vector<16x128xi1>, vector<16x128xf32>
    %10 = math.absf %9 : vector<16x128xf32>
    %cst_5 = arith.constant 1.000000e+01 : f32
    %11 = vector.broadcast %cst_5 : f32 to vector<16x128xf32>
    %12 = arith.cmpf olt, %10, %11 : vector<16x128xf32>
    %cst_6 = arith.constant 5.000000e-01 : f32
    %13 = vector.broadcast %cst_6 : f32 to vector<16x128xf32>
    %14 = arith.mulf %10, %13 : vector<16x128xf32>
    %15 = math.log1p %14 : vector<16x128xf32>
    %cst_7 = arith.constant 1.000000e+01 : f32
    %16 = vector.broadcast %cst_7 : f32 to vector<16x128xf32>
    %17 = arith.mulf %16, %15 : vector<16x128xf32>
    %cst_8 = arith.constant -7.9175949 : f32
    %18 = vector.broadcast %cst_8 : f32 to vector<16x128xf32>
    %19 = arith.subf %10, %18 : vector<16x128xf32>
    %20 = arith.select %12, %17, %19 : vector<16x128xi1>, vector<16x128xf32>
    %21 = vector.shape_cast %20 : vector<16x128xf32> to vector<2x8x128xf32>
    %cst_9 = arith.constant dense<0.000000e+00> : vector<8x128xf32>
    %22 = vector.multi_reduction <add>, %21, %cst_9 [0] : vector<2x8x128xf32> to vector<8x128xf32>
    %c0_10 = arith.constant 0 : index
    %c0_11 = arith.constant 0 : index
    %c0_12 = arith.constant 0 : index
    %23 = vector.load %arg4[%c0_10, %c0_11, %c0_12] : memref<1x8x128xf32, #tpu.memory_space<vmem>>, vector<1x8x128xf32>
    %24 = vector.shape_cast %22 : vector<8x128xf32> to vector<1x8x128xf32>
    %25 = arith.addf %23, %24 : vector<1x8x128xf32>
    %c0_13 = arith.constant 0 : index
    %c0_14 = arith.constant 0 : index
    %c0_15 = arith.constant 0 : index
    %26 = vector.load %arg4[%c0_13, %c0_14, %c0_15] : memref<1x8x128xf32, #tpu.memory_space<vmem>>, vector<1x8x128xf32>
    tpu.vector_store %arg4[%c0_13, %c0_14, %c0_15], %25 {strides = array<i32>} : memref<1x8x128xf32, #tpu.memory_space<vmem>>, vector<1x8x128xf32>,
    return
  }
  func.func @transform_0(%arg0: i32, %arg1: i32) -> (i32, i32) {
    %c1_i32 = arith.constant 1 : i32
    %0 = arith.muli %arg0, %c1_i32 : i32
    %1 = arith.addi %0, %arg1 : i32
    %c0_i32 = arith.constant 0 : i32
    %c0_i32_0 = arith.constant 0 : i32
    return %1, %c0_i32 : i32, i32
  }
  func.func @transform_1(%arg0: i32, %arg1: i32) -> (i32, i32) {
    %c1_i32 = arith.constant 1 : i32
    %0 = arith.muli %arg0, %c1_i32 : i32
    %1 = arith.addi %0, %arg1 : i32
    %c0_i32 = arith.constant 0 : i32
    %c0_i32_0 = arith.constant 0 : i32
    return %1, %c0_i32 : i32, i32
  }
  func.func @transform_2(%arg0: i32, %arg1: i32) -> (i32, i32, i32) {
    %c0_i32 = arith.constant 0 : i32
    %c0_i32_0 = arith.constant 0 : i32
    %c0_i32_1 = arith.constant 0 : i32
    return %arg0, %c0_i32, %c0_i32_0 : i32, i32, i32
  }
}

</mosaic_0001>

<bundles_post_ra>
// kernel: tpu_custom_call.1
= control target key start
LH: loop header
LB: loop body
LE: loop exit
PB: predicated region body
PF: predicated region fallthrough
CT: control target
= control target key end

     0   :  { %7 = vsyncpa [#allocation3], 0  ;;  %s257_s0 = inlined_call_operand.hbm [shape: f32[16,128], index: 0, kind: input, shape index: {}]   ;;  %s258_s1 = inlined_call_operand.hbm [shape: f32[16,128], index: 1, kind: input, shape index: {}]   ;;  %s259_s2 = inlined_call_operand.hbm [shape: f32[1,8,128], index: 2, kind: output, shape index: {}]  }
   0x1   :  { %8 = vsyncpa [#allocation6], 0 }
   0x2   :  { %9 = vsyncpa [#allocation4], 0  ;;  %s201_s9 = smov [#allocation2]   ;;  %s129_s13 = scalar_lea.hbm %s257_s0, 256 }
   0x3   :  { %s19_s10 = sshll.u32 %s201_s9, 4  ;;  %p130_p0 = scmp.ne.s32.totalorder %s257_s0, %s129_s13  ;;  %s20_s10 = int_to_ptr.vmem [resolvable:$true] %s19_s10 }
   0x4   :  { %p133_p1 = scmp.lt.u32.totalorder %s129_s13, %s257_s0 }
   0x6   :  { %p135_p2 = pnand %p133_p1, %p130_p0 }
   0x8   :  { %138 = shalt.err (!%p135_p2)
}
   0x9   :  { %s139_s18 = scalar_lea.vmem %s20_s10, 256  ;;  %p144_p4 = scmp.lt.s32.totalorder %s20_s10, %s20_s10 }
   0xa   :  { %p140_p3 = scmp.ne.s32.totalorder %s20_s10, %s139_s18  ;;  %p145_p5 = scmp.lt.s32.totalorder %s139_s18, %s139_s18 }
   0xc   :  { %p146_p6 = por %p145_p5, %p144_p4 }
   0xe   :  { %p147_p7 = pnand %p146_p6, %p140_p3 }
  0x10   :  { %150 = shalt.err (!%p147_p7)
}
  0x11   :  { %s202_s19 = smov 128   ;;  %s203_s20 = smov 8  }
  0x12   :  { %25 = dma.hbm_to_vmem [thread:$0]  %s257_s0, 256, %s20_s10, [#allocation3], %s202_s19, %s202_s19, %s203_s20  }
  0x13   :  { %s204_s23 = smov [#allocation5]   ;;  %s151_s27 = scalar_lea.hbm %s258_s1, 256 }
  0x14   :  { %s35_s24 = sshll.u32 %s204_s23, 4  ;;  %p152_p8 = scmp.ne.s32.totalorder %s258_s1, %s151_s27  ;;  %s36_s24 = int_to_ptr.vmem [resolvable:$true] %s35_s24 }
  0x15   :  { %p155_p9 = scmp.lt.u32.totalorder %s151_s27, %s258_s1 }
  0x17   :  { %p157_p10 = pnand %p155_p9, %p152_p8 }
  0x19   :  { %160 = shalt.err (!%p157_p10)
}
  0x1a   :  { %s161_s4 = scalar_lea.vmem %s36_s24, 256  ;;  %p166_p12 = scmp.lt.s32.totalorder %s36_s24, %s36_s24 }
  0x1b   :  { %p162_p11 = scmp.ne.s32.totalorder %s36_s24, %s161_s4  ;;  %p167_p13 = scmp.lt.s32.totalorder %s161_s4, %s161_s4 }
  0x1d   :  { %p168_p0 = por %p167_p13, %p166_p12 }
  0x1f   :  { %p169_p1 = pnand %p168_p0, %p162_p11 }
  0x21   :  { %172 = shalt.err (!%p169_p1)
}
  0x22   :  { %41 = dma.hbm_to_vmem [thread:$0]  %s258_s1, 256, %s36_s24, [#allocation6], %s202_s19, %s202_s19, %s203_s20  }
  0x23   :  { %195 = dma.done.wait [#allocation3], 256  }
  0x24   :  { %196 = vsyncadd [#allocation3], 4294967040 }
  0x25   :  { %197 = dma.done.wait [#allocation6], 256  }
  0x26   :  { %198 = vsyncadd [#allocation6], 4294967040  ;;  %v57_v0 = vld [vmem:[#allocation2] sm:$0xff]  ;;  %v58_v1 = vld [vmem:[#allocation2 + $0x8] sm:$0xff]  ;;  %s205_s1 = smov [#allocation7]  }
  0x27   :  { %v59_v2 = vld [vmem:[#allocation5] sm:$0xff]  ;;  %v60_v3 = vld [vmem:[#allocation5 + $0x8] sm:$0xff]  ;;  %s107_s6 = sshll.u32 %s205_s1, 4  ;;  %s108_s6 = int_to_ptr.vmem [resolvable:$true] %s107_s6 }
  0x28   :  { %vm61_vm0 = vcmp.ne.f32.partialorder %v59_v2, -1.0  ;;  %v63_v4 = vsub.f32 %v57_v0, %v59_v2  ;;  %vm62_vm1 = vcmp.ne.f32.partialorder %v60_v3, -1.0  ;;  %v64_v5 = vsub.f32 %v58_v1, %v60_v3  ;;  %s173_s7 = scalar_lea.vmem %s108_s6, 128  ;;  %p178_p3 = scmp.lt.s32.totalorder %s108_s6, %s108_s6 }
  0x29   :  { %p174_p2 = scmp.ne.s32.totalorder %s108_s6, %s173_s7  ;;  %p179_p4 = scmp.lt.s32.totalorder %s173_s7, %s173_s7 }
  0x2a   :  { %v65_v6 = vsel %vm61_vm0, %v63_v4, 0.0  ;;  %v66_v7 = vsel %vm62_vm1, %v64_v5, 0.0 }
  0x2b   :  { %v67_v8 = vand.u32 2147483647, %v65_v6  ;;  %v68_v9 = vand.u32 2147483647, %v66_v7  ;;  %p180_p5 = por %p179_p4, %p178_p3 }
  0x2d   :  { %v71_v10 = vmul.f32 0.5, %v67_v8  ;;  %v72_v11 = vmul.f32 0.5, %v68_v9  ;;  %v117_v26 = vadd.f32 7.917595, %v67_v8  ;;  %vm69_vm4 = vcmp.lt.f32.partialorder %v67_v8, 10.0  ;;  %p181_p6 = pnand %p180_p5, %p174_p2 }
  0x2e   :  { %v118_v28 = vadd.f32 7.917595, %v68_v9  ;;  %vm70_vm5 = vcmp.lt.f32.partialorder %v68_v9, 10.0 }
  0x2f   :  { %v73_v12 = vadd.f32 1.0, %v71_v10  ;;  %v82_v13 = vadd.f32 1.0, %v72_v11  ;;  %v76_v14 = vmul.f32 -0.5, %v71_v10  ;;  %v85_v15 = vmul.f32 -0.5, %v72_v11 }
  0x30   :  { %v79_v17 = vand.u32 2147483647, %v71_v10  ;;  %v88_v19 = vand.u32 2147483647, %v72_v11 }
  0x31   :  { %125 = vlog2.f32 %v73_v12  ;;  %v77_v16 = vadd.f32 1.0, %v76_v14  ;;  %v86_v18 = vadd.f32 1.0, %v85_v15 }
  0x32   :  { %127 = vlog2.f32 %v82_v13  ;;  %vm80_vm2 = vcmp.lt.f32.partialorder %v79_v17, 0.0004427343  ;;  %vm89_vm3 = vcmp.lt.f32.partialorder %v88_v19, 0.0004427343 }
  0x33   :  { %v78_v20 = vmul.f32 %v77_v16, %v71_v10  ;;  %v87_v22 = vmul.f32 %v86_v18, %v72_v11 }
  0x3b   :  { %v126_v21 = vpop.eup %125 }
  0x3c   :  { %v128_v23 = vpop.eup %127  ;;  %v75_v24 = vmul.f32 0.6931472, %v126_v21 }
  0x3d   :  { %v84_v25 = vmul.f32 0.6931472, %v128_v23 }
  0x3e   :  { %v81_v27 = vsel %vm80_vm2, %v78_v20, %v75_v24 }
  0x3f   :  { %v90_v29 = vsel %vm89_vm3, %v87_v22, %v84_v25  ;;  %v91_v30 = vmul.f32 10.0, %v81_v27 }
  0x40   :  { %v92_v31 = vmul.f32 10.0, %v90_v29 }
  0x41   :  { %v95_v32 = vsel %vm69_vm4, %v91_v30, %v117_v26 }
  0x42   :  { %v96_v33 = vsel %vm70_vm5, %v92_v31, %v118_v28 }
  0x43   :  { %v97_v34 = vadd.f32 %v96_v33, %v95_v32 }
  0x45   :  { %100 = vst [vmem:[#allocation7] sm:$0xff] %v97_v34 }
  0x46   :  { %184 = shalt.err (!%p181_p6)
}
  0x47   :  { %s185_s10 = scalar_lea.hbm %s259_s2, 128 }
  0x48   :  { %p186_p7 = scmp.ne.s32.totalorder %s259_s2, %s185_s10  ;;  %p189_p8 = scmp.lt.u32.totalorder %s185_s10, %s259_s2 }
  0x4a   :  { %p191_p9 = pnand %p189_p8, %p186_p7 }
  0x4c   :  { %194 = shalt.err (!%p191_p9)
}
  0x4d   :  { %110 = dma.vmem_to_hbm [thread:$0]  %s108_s6, 128, %s259_s2, [#allocation4]  }
  0x4e   :  { %199 = dma.done.wait [#allocation4], 128  }
  0x4f   :  { %200 = vsyncadd [#allocation4], 4294967168 }
  0x50   :  { %114 = vsyncpa [#allocation3], 1 }
  0x51   :  { %115 = vsyncpa [#allocation6], 1 }
  0x52   :  { %116 = vsyncpa [#allocation4], 1 }

</bundles_post_ra>
